<compile_context>
chip_gen: v6e
topology: v6e:2x2x1
jax: 0.10.0
libtpu: 0.0.40
codegen_flags: <defaults>
</compile_context>

<pallas_src>
import jax
import jax.numpy as jnp
from jax.experimental import pallas as pl
from jax.experimental.pallas import tpu as pltpu

NEG_SLOPE = 0.01          # nn.LeakyReLU default
C_IN, C1, C2 = 6, 64, 128
LANE, SUBLANE = 128, 8
C_IN_PAD = SUBLANE        # pad 6 -> 8 channels


def _leaky_relu(x):
    return jnp.where(x >= 0, x, NEG_SLOPE * x)


def _round_up(x, m):
    return ((x + m - 1) // m) * m


def pointfeat_kernel(x_ref, w1_ref, b1_ref, w2_ref, b2_ref, w3_ref, b3_ref,
                     o_ref, acc_ref):
    """One (batch b, point-tile n) grid step.

    x_ref : (1, 8, Nt)    bf16  channel-major input tile (points on lanes)
    w*_ref: (C_out, C_in)       transposed weights (w1 f32, w2/w3 bf16)
    b*_ref: (C_out, 1)    f32   biases
    o_ref : (1, F_pad, 1) f32   pooled features (written on last n step)
    acc_ref:(F_pad, 1)    f32   running max over point tiles
    """
    n = pl.program_id(1)

    @pl.when(n == 0)
    def _init():
        acc_ref[...] = jnp.full(acc_ref.shape, -jnp.inf, jnp.float32)

    x = x_ref[0].astype(jnp.float32)                                    # (8, Nt)

    # layer 1 (f32, tiny K=8): (64, 8) @ (8, Nt)
    h1 = jnp.dot(w1_ref[...], x, preferred_element_type=jnp.float32)
    h1 = _leaky_relu(h1 + b1_ref[...]).astype(jnp.bfloat16)             # (64, Nt)

    # layer 2 (bf16 MXU): (128, 64) @ (64, Nt)
    h2 = jnp.dot(w2_ref[...], h1, preferred_element_type=jnp.float32)
    h2 = _leaky_relu(h2 + b2_ref[...]).astype(jnp.bfloat16)             # (128, Nt)

    # layer 3 (bf16 MXU): (F_pad, 128) @ (128, Nt)
    h3 = jnp.dot(w3_ref[...], h2, preferred_element_type=jnp.float32)
    h3 = h3 + b3_ref[...]                                               # (F_pad, Nt)

    # fold this tile's max-over-points into the running max (lane reduce, XLU)
    acc_ref[...] = jnp.maximum(acc_ref[...],
                               jnp.max(h3, axis=-1, keepdims=True))     # (F_pad, 1)

    @pl.when(n == pl.num_programs(1) - 1)
    def _store():
        o_ref[0] = acc_ref[...]


def pointfeat_cnn(x_ncw, params, *, max_tile=2048):
    """x_ncw: (B, 6, N) f32 -> (B, feature_dim, 1) f32, matching PyTorch."""
    w1, b1, w2, b2, w3, b3 = params
    B, c_in, N = x_ncw.shape
    assert c_in == C_IN
    F = w3.shape[1]
    F_pad = _round_up(F, LANE)

    # --- point-axis tiling -------------------------------------------------
    n_pad = _round_up(N, LANE)
    nt = min(max_tile, n_pad)
    n_pad = _round_up(n_pad, nt)
    n_tiles = n_pad // nt

    # --- input prep: bf16, channels 6->8 (zeros), N padded by replicating
    #     point 0 (a duplicated real point cannot change the max pool).
    x = x_ncw.astype(jnp.bfloat16)
    x = jnp.pad(x, ((0, 0), (0, C_IN_PAD - C_IN), (0, 0)))
    if n_pad != N:
        fill = jnp.broadcast_to(x[:, :, :1], (B, C_IN_PAD, n_pad - N))
        x = jnp.concatenate([x, fill], axis=-1)

    # --- params: (C_out, C_in) weights, column biases, lane/sublane padding --
    w1t = jnp.pad(w1.T, ((0, 0), (0, C_IN_PAD - C_IN))).astype(jnp.float32)  # (64, 8)
    w2t = w2.T.astype(jnp.bfloat16)                                          # (128, 64)
    w3t = jnp.pad(w3.T, ((0, F_pad - F), (0, 0))).astype(jnp.bfloat16)       # (F_pad, 128)
    b1c = b1.reshape(C1, 1).astype(jnp.float32)
    b2c = b2.reshape(C2, 1).astype(jnp.float32)
    b3c = jnp.pad(b3.reshape(F, 1), ((0, F_pad - F), (0, 0))).astype(jnp.float32)

    const = lambda shape: pl.BlockSpec(shape, lambda b, n: (0,) * len(shape))

    out = pl.pallas_call(
        pointfeat_kernel,
        out_shape=jax.ShapeDtypeStruct((B, F_pad, 1), jnp.float32),
        grid=(B, n_tiles),
        in_specs=[
            pl.BlockSpec((1, C_IN_PAD, nt), lambda b, n: (b, 0, n)),  # x tile
            const((C1, C_IN_PAD)), const((C1, 1)),                    # layer 1
            const((C2, C1)),       const((C2, 1)),                    # layer 2
            const((F_pad, C2)),    const((F_pad, 1)),                 # layer 3
        ],
        out_specs=pl.BlockSpec((1, F_pad, 1), lambda b, n: (b, 0, 0)),
        scratch_shapes=[pltpu.VMEM((F_pad, 1), jnp.float32)],
        compiler_params=pltpu.CompilerParams(
            dimension_semantics=("parallel", "arbitrary")),
    )(x, w1t, b1c, w2t, b2c, w3t, b3c)

    return out[:, :F, :]  # drop padded feature channels -> (B, F, 1)


def init_params(key, feature_dim):
    """Deterministic synthetic params, Conv1d-like fan-in scaling.

    Weights stored (C_in, C_out), biases (1, C_out); the wrapper transposes /
    pads / casts them for the kernel.
    """
    dims = [(C_IN, C1), (C1, C2), (C2, feature_dim)]
    params = []
    for i, (cin, cout) in enumerate(dims):
        kw, kb = jax.random.split(jax.random.fold_in(key, i))
        bound = 1.0 / jnp.sqrt(cin)
        w = jax.random.uniform(kw, (cin, cout), jnp.float32, -bound, bound)
        b = jax.random.uniform(kb, (1, cout), jnp.float32, -bound, bound)
        params += [w, b]
    return tuple(params)


def _reference(x_ncw, params):
    """Plain-JAX reference mirroring the kernel's bf16/f32 mixed precision."""
    w1, b1, w2, b2, w3, b3 = params
    x = jnp.transpose(x_ncw, (0, 2, 1)).astype(jnp.bfloat16).astype(jnp.float32)
    h = _leaky_relu(x @ w1 + b1).astype(jnp.bfloat16)
    h = _leaky_relu(jnp.einsum("bnc,cd->bnd", h, w2.astype(jnp.bfloat16),
                               preferred_element_type=jnp.float32) + b2)
    h = h.astype(jnp.bfloat16)
    h = jnp.einsum("bnc,cd->bnd", h, w3.astype(jnp.bfloat16),
                   preferred_element_type=jnp.float32) + b3
    return jnp.max(h, axis=1)[:, :, None]  # (B, F, 1)


if __name__ == "__main__":
    key = jax.random.PRNGKey(0)
    B, N, feature_dim = 2, 200, 32

    k_x, k_p = jax.random.split(key)
    x = jax.random.normal(k_x, (B, C_IN, N), jnp.float32)   # PyTorch NCW input
    params = init_params(k_p, feature_dim)

    ref = _reference(x, params)

    # multi-tile path: 2 point tiles of 128, remainder padded by replication
    out = jax.block_until_ready(pointfeat_cnn(x, params, max_tile=128))
    assert out.shape == (B, feature_dim, 1), out.shape
    assert jnp.allclose(out, ref, atol=1e-2, rtol=1e-2), "multi-tile mismatch"

    # single-tile path: default tile covers all points in one grid step
    out1 = jax.block_until_ready(pointfeat_cnn(x, params))
    assert jnp.allclose(out1, ref, atol=1e-2, rtol=1e-2), "single-tile mismatch"

    print("KERNEL_OK")
</pallas_src>

<mosaic_0001>
module attributes {stable_mosaic.version = 11 : i64} {
  func.func @pointfeat_kernel(%arg0: i32, %arg1: i32, %arg2: memref<1x8x128xbf16, #tpu.memory_space<vmem>>, %arg3: memref<64x8xf32, #tpu.memory_space<vmem>>, %arg4: memref<64x1xf32, #tpu.memory_space<vmem>>, %arg5: memref<128x64xbf16, #tpu.memory_space<vmem>>, %arg6: memref<128x1xf32, #tpu.memory_space<vmem>>, %arg7: memref<128x128xbf16, #tpu.memory_space<vmem>>, %arg8: memref<128x1xf32, #tpu.memory_space<vmem>>, %arg9: memref<1x128x1xf32, #tpu.memory_space<vmem>>, %arg10: memref<128x1xf32, #tpu.memory_space<vmem>>) attributes {dimension_semantics = [#tpu.dimension_semantics<parallel>, #tpu.dimension_semantics<arbitrary>], iteration_bounds = array<i64: 2, 2>, scalar_prefetch = 0 : i64, scratch_operands = 1 : i64, tpu.core_type = #tpu.core_type<tc>, window_params = [{transform_indices = @transform_0, window_bounds = array<i64: 1, 8, 128>}, {pipeline_mode = #tpu.pipeline_mode<synchronous>, transform_indices = @transform_1, window_bounds = array<i64: 64, 8>}, {pipeline_mode = #tpu.pipeline_mode<synchronous>, transform_indices = @transform_2, window_bounds = array<i64: 64, 1>}, {pipeline_mode = #tpu.pipeline_mode<synchronous>, transform_indices = @transform_3, window_bounds = array<i64: 128, 64>}, {pipeline_mode = #tpu.pipeline_mode<synchronous>, transform_indices = @transform_4, window_bounds = array<i64: 128, 1>}, {pipeline_mode = #tpu.pipeline_mode<synchronous>, transform_indices = @transform_5, window_bounds = array<i64: 128, 128>}, {pipeline_mode = #tpu.pipeline_mode<synchronous>, transform_indices = @transform_6, window_bounds = array<i64: 128, 1>}, {transform_indices = @transform_7, window_bounds = array<i64: 1, 128, 1>}]} {
    %c0_i32 = arith.constant 0 : i32
    %0 = arith.cmpi eq, %arg1, %c0_i32 : i32
    %1 = arith.extui %0 : i1 to i32
    %c0_i32_0 = arith.constant 0 : i32
    %2 = arith.cmpi ne, %1, %c0_i32_0 : i32
    scf.if %2 {
      %cst_27 = arith.constant 0xFF800000 : f32
      %41 = vector.broadcast %cst_27 : f32 to vector<128x1xf32>
      %c0_28 = arith.constant 0 : index
      %c0_29 = arith.constant 0 : index
      %42 = vector.load %arg10[%c0_28, %c0_29] : memref<128x1xf32, #tpu.memory_space<vmem>>, vector<128x1xf32>
      tpu.vector_store %arg10[%c0_28, %c0_29], %41 {strides = array<i32>} : memref<128x1xf32, #tpu.memory_space<vmem>>, vector<128x1xf32>,
    } else {
    }
    %c0 = arith.constant 0 : index
    %c0_1 = arith.constant 0 : index
    %c0_2 = arith.constant 0 : index
    %3 = vector.load %arg2[%c0, %c0_1, %c0_2] : memref<1x8x128xbf16, #tpu.memory_space<vmem>>, vector<1x8x128xbf16>
    %4 = vector.shape_cast %3 : vector<1x8x128xbf16> to vector<8x128xbf16>
    %5 = arith.extf %4 : vector<8x128xbf16> to vector<8x128xf32>
    %c0_3 = arith.constant 0 : index
    %c0_4 = arith.constant 0 : index
    %6 = vector.load %arg3[%c0_3, %c0_4] : memref<64x8xf32, #tpu.memory_space<vmem>>, vector<64x8xf32>
    %cst = arith.constant dense<0.000000e+00> : vector<64x128xf32>
    %7 = tpu.matmul %6, %5, %cst {dimension_numbers = #tpu.dot_dimension_numbers<[1], [0], [0], [1], [0, 0, 1, 1], [], []>} : vector<64x8xf32>, vector<8x128xf32>, vector<64x128xf32> -> vector<64x128xf32>
    %c0_5 = arith.constant 0 : index
    %c0_6 = arith.constant 0 : index
    %8 = vector.load %arg4[%c0_5, %c0_6] : memref<64x1xf32, #tpu.memory_space<vmem>>, vector<64x1xf32>
    %9 = vector.broadcast %8 : vector<64x1xf32> to vector<64x128xf32>
    %10 = arith.addf %7, %9 : vector<64x128xf32>
    %cst_7 = arith.constant 0.000000e+00 : f32
    %11 = vector.broadcast %cst_7 : f32 to vector<64x128xf32>
    %12 = arith.cmpf oge, %10, %11 : vector<64x128xf32>
    %cst_8 = arith.constant 0.00999999977 : f32
    %13 = vector.broadcast %cst_8 : f32 to vector<64x128xf32>
    %14 = arith.mulf %13, %10 : vector<64x128xf32>
    %15 = arith.select %12, %10, %14 : vector<64x128xi1>, vector<64x128xf32>
    %16 = arith.truncf %15 : vector<64x128xf32> to vector<64x128xbf16>
    %c0_9 = arith.constant 0 : index
    %c0_10 = arith.constant 0 : index
    %17 = vector.load %arg5[%c0_9, %c0_10] : memref<128x64xbf16, #tpu.memory_space<vmem>>, vector<128x64xbf16>
    %cst_11 = arith.constant dense<0.000000e+00> : vector<128x128xf32>
    %18 = tpu.matmul %17, %16, %cst_11 {dimension_numbers = #tpu.dot_dimension_numbers<[1], [0], [0], [1], [0, 0, 1, 1], [], []>} : vector<128x64xbf16>, vector<64x128xbf16>, vector<128x128xf32> -> vector<128x128xf32>
    %c0_12 = arith.constant 0 : index
    %c0_13 = arith.constant 0 : index
    %19 = vector.load %arg6[%c0_12, %c0_13] : memref<128x1xf32, #tpu.memory_space<vmem>>, vector<128x1xf32>
    %20 = vector.broadcast %19 : vector<128x1xf32> to vector<128x128xf32>
    %21 = arith.addf %18, %20 : vector<128x128xf32>
    %cst_14 = arith.constant 0.000000e+00 : f32
    %22 = vector.broadcast %cst_14 : f32 to vector<128x128xf32>
    %23 = arith.cmpf oge, %21, %22 : vector<128x128xf32>
    %cst_15 = arith.constant 0.00999999977 : f32
    %24 = vector.broadcast %cst_15 : f32 to vector<128x128xf32>
    %25 = arith.mulf %24, %21 : vector<128x128xf32>
    %26 = arith.select %23, %21, %25 : vector<128x128xi1>, vector<128x128xf32>
    %27 = arith.truncf %26 : vector<128x128xf32> to vector<128x128xbf16>
    %c0_16 = arith.constant 0 : index
    %c0_17 = arith.constant 0 : index
    %28 = vector.load %arg7[%c0_16, %c0_17] : memref<128x128xbf16, #tpu.memory_space<vmem>>, vector<128x128xbf16>
    %cst_18 = arith.constant dense<0.000000e+00> : vector<128x128xf32>
    %29 = tpu.matmul %28, %27, %cst_18 {dimension_numbers = #tpu.dot_dimension_numbers<[1], [0], [0], [1], [0, 0, 1, 1], [], []>} : vector<128x128xbf16>, vector<128x128xbf16>, vector<128x128xf32> -> vector<128x128xf32>
    %c0_19 = arith.constant 0 : index
    %c0_20 = arith.constant 0 : index
    %30 = vector.load %arg8[%c0_19, %c0_20] : memref<128x1xf32, #tpu.memory_space<vmem>>, vector<128x1xf32>
    %31 = vector.broadcast %30 : vector<128x1xf32> to vector<128x128xf32>
    %32 = arith.addf %29, %31 : vector<128x128xf32>
    %c0_21 = arith.constant 0 : index
    %c0_22 = arith.constant 0 : index
    %33 = vector.load %arg10[%c0_21, %c0_22] : memref<128x1xf32, #tpu.memory_space<vmem>>, vector<128x1xf32>
    %cst_23 = arith.constant dense<0xFF800000> : vector<128xf32>
    %34 = vector.multi_reduction <maximumf>, %32, %cst_23 [1] : vector<128x128xf32> to vector<128xf32>
    %35 = vector.shape_cast %34 : vector<128xf32> to vector<128x1xf32>
    %36 = arith.maximumf %33, %35 : vector<128x1xf32>
    %c0_24 = arith.constant 0 : index
    %c0_25 = arith.constant 0 : index
    %37 = vector.load %arg10[%c0_24, %c0_25] : memref<128x1xf32, #tpu.memory_space<vmem>>, vector<128x1xf32>
    tpu.vector_store %arg10[%c0_24, %c0_25], %36 {strides = array<i32>} : memref<128x1xf32, #tpu.memory_space<vmem>>, vector<128x1xf32>,
    %c1_i32 = arith.constant 1 : i32
    %38 = arith.cmpi eq, %arg1, %c1_i32 : i32
    %39 = arith.extui %38 : i1 to i32
    %c0_i32_26 = arith.constant 0 : i32
    %40 = arith.cmpi ne, %39, %c0_i32_26 : i32
    scf.if %40 {
      %c0_27 = arith.constant 0 : index
      %c0_28 = arith.constant 0 : index
      %41 = vector.load %arg10[%c0_27, %c0_28] : memref<128x1xf32, #tpu.memory_space<vmem>>, vector<128x1xf32>
      %c0_29 = arith.constant 0 : index
      %c0_30 = arith.constant 0 : index
      %c0_31 = arith.constant 0 : index
      %42 = vector.load %arg9[%c0_29, %c0_30, %c0_31] : memref<1x128x1xf32, #tpu.memory_space<vmem>>, vector<1x128x1xf32>
      %43 = vector.shape_cast %42 : vector<1x128x1xf32> to vector<128x1xf32>
      %44 = vector.shape_cast %41 : vector<128x1xf32> to vector<1x128x1xf32>
      tpu.vector_store %arg9[%c0_29, %c0_30, %c0_31], %44 {strides = array<i32>} : memref<1x128x1xf32, #tpu.memory_space<vmem>>, vector<1x128x1xf32>,
    } else {
    }
    return
  }
  func.func @transform_0(%arg0: i32, %arg1: i32) -> (i32, i32, i32) {
    %c0_i32 = arith.constant 0 : i32
    %c0_i32_0 = arith.constant 0 : i32
    return %arg0, %c0_i32, %arg1 : i32, i32, i32
  }
  func.func @transform_1(%arg0: i32, %arg1: i32) -> (i32, i32) {
    %c0_i32 = arith.constant 0 : i32
    %c0_i32_0 = arith.constant 0 : i32
    %c0_i32_1 = arith.constant 0 : i32
    return %c0_i32, %c0_i32_0 : i32, i32
  }
  func.func @transform_2(%arg0: i32, %arg1: i32) -> (i32, i32) {
    %c0_i32 = arith.constant 0 : i32
    %c0_i32_0 = arith.constant 0 : i32
    %c0_i32_1 = arith.constant 0 : i32
    return %c0_i32, %c0_i32_0 : i32, i32
  }
  func.func @transform_3(%arg0: i32, %arg1: i32) -> (i32, i32) {
    %c0_i32 = arith.constant 0 : i32
    %c0_i32_0 = arith.constant 0 : i32
    %c0_i32_1 = arith.constant 0 : i32
    return %c0_i32, %c0_i32_0 : i32, i32
  }
  func.func @transform_4(%arg0: i32, %arg1: i32) -> (i32, i32) {
    %c0_i32 = arith.constant 0 : i32
    %c0_i32_0 = arith.constant 0 : i32
    %c0_i32_1 = arith.constant 0 : i32
    return %c0_i32, %c0_i32_0 : i32, i32
  }
  func.func @transform_5(%arg0: i32, %arg1: i32) -> (i32, i32) {
    %c0_i32 = arith.constant 0 : i32
    %c0_i32_0 = arith.constant 0 : i32
    %c0_i32_1 = arith.constant 0 : i32
    return %c0_i32, %c0_i32_0 : i32, i32
  }
  func.func @transform_6(%arg0: i32, %arg1: i32) -> (i32, i32) {
    %c0_i32 = arith.constant 0 : i32
    %c0_i32_0 = arith.constant 0 : i32
    %c0_i32_1 = arith.constant 0 : i32
    return %c0_i32, %c0_i32_0 : i32, i32
  }
  func.func @transform_7(%arg0: i32, %arg1: i32) -> (i32, i32, i32) {
    %c0_i32 = arith.constant 0 : i32
    %c0_i32_0 = arith.constant 0 : i32
    %c0_i32_1 = arith.constant 0 : i32
    return %arg0, %c0_i32, %c0_i32_0 : i32, i32, i32
  }
}

</mosaic_0001>

<bundles_post_ra>
// kernel: tpu_custom_call.1
= control target key start
LH: loop header
LB: loop body
LE: loop exit
PB: predicated region body
PF: predicated region fallthrough
CT: control target
= control target key end

     0   :  { %s1627_s24 = smov 0   ;;  %s1629_s25 = smov 0   ;;  %s1973_s0 = inlined_call_operand.vmem [shape: bf16[2,8,256], index: 0, kind: input, shape index: {}]   ;;  %s1974_s1 = inlined_call_operand.vmem [shape: f32[64,8], index: 1, kind: input, shape index: {}]   ;;  %s1975_s2 = inlined_call_operand.vmem [shape: f32[64,1], index: 2, kind: input, shape index: {}]   ;;  %s1976_s3 = inlined_call_operand.vmem [shape: bf16[128,64], index: 3, kind: input, shape index: {}]   ;;  %s1977_s4 = inlined_call_operand.vmem [shape: f32[128,1], index: 4, kind: input, shape index: {}]   ;;  %s1978_s5 = inlined_call_operand.vmem [shape: bf16[128,128], index: 5, kind: input, shape index: {}]   ;;  %s1979_s6 = inlined_call_operand.vmem [shape: f32[128,1], index: 6, kind: input, shape index: {}]   ;;  %s1980_s7 = inlined_call_operand.vmem [shape: f32[2,128,1], index: 7, kind: output, shape index: {}]  }
   0x1   :  { %s1631_s26 = smov 0   ;;  %s1633_s27 = smov 0  }
   0x2   :  { %s1635_s28 = smov 0  }
   0x3 LB: > { %s26_s29 = sadd.s32 1, %s1575_s26  ;;  %s29_s30 = sadd.s32 1, %s1579_s27  ;;  %s1583_s28 = sphi %s1635_s28, %s17_s28   ;;  %s1579_s27 = sphi %s1633_s27, %s1984_s27   ;;  %s1575_s26 = sphi %s1631_s26, %s1983_s26   ;;  %s1571_s25 = sphi %s1629_s25, %s1982_s25   ;;  %s1567_s24 = sphi %s1627_s24, %s1981_s24  }
   0x4   : > { %p27_p0 = scmp.ge.s32.totalorder %s26_s29, 2  ;;  %p1320_p1 = scmp.ge.s32.totalorder %s1583_s28, 1 }
   0x5   : > { %p254_p2 = scmp.lt.s32.totalorder %s1583_s28, 5 }
   0x6   : > { %s1986_s29 = smov (%p27_p0, %s26_s29), 0  ;;  %s1988_s30 = smov (!%p27_p0, %s29_s30), %s1579_s27 }
   0x7   : > { %p255_p3 = pnand %p1320_p1, %p254_p2  ;;  %p31_p4 = scmp.ge.s32.totalorder %s1988_s30, 2 }
   0x8   : > { %p289_p5 = scmp.lt.s32.totalorder (!%p255_p3), %s1571_s25, 1  ;;  %p291_p6 = scmp.lt.s32.totalorder (!%p255_p3), %s1567_s24, 1 }
   0x9   : > { %s1990_s30 = smov (%p31_p4, %s1988_s30), 0  ;;  %258 = sbr.rel (%p255_p3) target bundleno = 904 (0x388), region = 48 }
   0xa   : > { %p1325_p7 = scmp.ne.s32.totalorder (!%p255_p3), %s1567_s24, 0 }
   0xe   : > { %s1992_s25 = smov (!%p289_p5, %s1571_s25), 1 }
   0xf   : > { %s292_s8 = scalar_select %p291_p6, %s1567_s24, 1 }
  0x10   : > { %s1321_s9 = sshll.u32 %s1992_s25, 1  ;;  %s1361_s10 = sshll.u32 %s1992_s25, 7 }
  0x11   : > { %s294_s11 = sadd.s32 %s1321_s9, %s292_s8  ;;  %s1664_s14 = scalar_lea.vmem %s1980_s7, %s1361_s10 }
  0x12   : > { %s1322_s15 = sshll.u32 %s294_s11, 2  ;;  %306 = sbr.rel (%p1325_p7) target bundleno = 32 (0x20), region = 52 }
  0x13   : > { %s296_s18 = scalar_lea.vmem %s1973_s0, %s1322_s15 }
  0x17   : > { %vm307_vm0 = vcmask 7168   ;;  %v1585_v0 = vmov -inf  }
  0x18   : > { %308 = vst.msk [vmem:[#allocation2] sm:$0xff] %vm307_vm0, %v1585_v0  ;;  %309 = vst.msk [vmem:[#allocation2 + $0x8] sm:$0xff] %vm307_vm0, %v1585_v0 }
  0x19   : > { %310 = vst.msk [vmem:[#allocation2 + $0x10] sm:$0xff] %vm307_vm0, %v1585_v0  ;;  %311 = vst.msk [vmem:[#allocation2 + $0x18] sm:$0xff] %vm307_vm0, %v1585_v0 }
  0x1a   : > { %312 = vst.msk [vmem:[#allocation2 + $0x20] sm:$0xff] %vm307_vm0, %v1585_v0  ;;  %313 = vst.msk [vmem:[#allocation2 + $0x28] sm:$0xff] %vm307_vm0, %v1585_v0 }
  0x1b   : > { %314 = vst.msk [vmem:[#allocation2 + $0x30] sm:$0xff] %vm307_vm0, %v1585_v0  ;;  %315 = vst.msk [vmem:[#allocation2 + $0x38] sm:$0xff] %vm307_vm0, %v1585_v0 }
  0x1c   : > { %316 = vst.msk [vmem:[#allocation2 + $0x40] sm:$0xff] %vm307_vm0, %v1585_v0  ;;  %317 = vst.msk [vmem:[#allocation2 + $0x48] sm:$0xff] %vm307_vm0, %v1585_v0 }
  0x1d   : > { %318 = vst.msk [vmem:[#allocation2 + $0x50] sm:$0xff] %vm307_vm0, %v1585_v0  ;;  %319 = vst.msk [vmem:[#allocation2 + $0x58] sm:$0xff] %vm307_vm0, %v1585_v0 }
  0x1e   : > { %320 = vst.msk [vmem:[#allocation2 + $0x60] sm:$0xff] %vm307_vm0, %v1585_v0  ;;  %321 = vst.msk [vmem:[#allocation2 + $0x68] sm:$0xff] %vm307_vm0, %v1585_v0 }
  0x1f   : > { %322 = vst.msk [vmem:[#allocation2 + $0x70] sm:$0xff] %vm307_vm0, %v1585_v0  ;;  %323 = vst.msk [vmem:[#allocation2 + $0x78] sm:$0xff] %vm307_vm0, %v1585_v0 }
  0x20 PF: > { %v324_v1 = vld [vmem:[%s296_s18] sm:$0xf]  ;;  %vm382_vm1 = vcmask 64512   ;;  %v1586_v4 = vmov 0   ;;  %v340_v5 = vld [vmem:[%s1975_s2 + $0x30] sm:$0xff]  ;;  %v327_v6 = vld [vmem:[%s1974_s1 + $0x8] sm:$0xff] }
  0x21   : > { %v326_v2 = vld [vmem:[%s1974_s1] sm:$0xff]  ;;  %v325_v3 = vunpack.c.l.bf16 %v324_v1  ;;  %1527 = vset.pattern.permute.xlu0 %v1586_v4  ;;  %1528 = vset.pattern.permute.xlu1 %v1586_v4  ;;  %v328_v8 = vld [vmem:[%s1974_s1 + $0x10] sm:$0xff]  ;;  %v341_v9 = vld [vmem:[%s1975_s2 + $0x38] sm:$0xff]  ;;  %vm692_vm2 = vcmask 523264   ;;  %p1358_p8 = scmp.ne.s32.totalorder %s1567_s24, 1 }
  0x22   : > { %1401 = vmatprep.mubr.msk.f32.mxu0 %vm382_vm1, %v326_v2  ;;  %374 = vperm.xlu0 %1527, %v340_v5   ;;  %v338_v7 = vld [vmem:[%s1975_s2 + $0x20] sm:$0xff]  ;;  %v339_v10 = vld [vmem:[%s1975_s2 + $0x28] sm:$0xff]  ;;  %v329_v11 = vld [vmem:[%s1974_s1 + $0x18] sm:$0xff] }
  0x23   : > { %1399 = vmatprep.subr.mxu0 %v325_v3  ;;  %364 = vperm.xlu1 %1528, %v338_v7   ;;  %v330_v12 = vld [vmem:[%s1974_s1 + $0x20] sm:$0xff]  ;;  %v336_v13 = vld [vmem:[%s1975_s2 + $0x10] sm:$0xff]  ;;  %v337_v14 = vld [vmem:[%s1975_s2 + $0x18] sm:$0xff] }
  0x24   : > { %1400 = vmatpush3.msra.mxu0 %v325_v3  ;;  %v331_v15 = vld [vmem:[%s1974_s1 + $0x28] sm:$0xff]  ;;  %v332_v16 = vld [vmem:[%s1974_s1 + $0x30] sm:$0xff]  ;;  %v334_v17 = vld [vmem:[%s1975_s2] sm:$0xff] }
  0x25   : > { %1402 = vmatmul.mubr.msk.f32.vlgmr.msra.gmra.mxu0 %vm382_vm1, %v327_v6  ;;  %v335_v18 = vld [vmem:[%s1975_s2 + $0x8] sm:$0xff]  ;;  %v333_v19 = vld [vmem:[%s1974_s1 + $0x38] sm:$0xff]  ;;  %v570_v20 = vld [vmem:[%s1977_s4 + $0x70] sm:$0xff] }
  0x26   : > { %1404 = vmatprep.mubr.msk.f32.mxu0 %vm382_vm1, %v328_v8  ;;  %379 = vperm.xlu0 %1527, %v341_v9   ;;  %v571_v21 = vld [vmem:[%s1977_s4 + $0x78] sm:$0xff]  ;;  %v568_v22 = vld [vmem:[%s1977_s4 + $0x60] sm:$0xff]  ;;  %v569_v23 = vld [vmem:[%s1977_s4 + $0x68] sm:$0xff] }
  0x27   : > { %369 = vperm.xlu1 %1528, %v339_v10   ;;  %v566_v24 = vld [vmem:[%s1977_s4 + $0x50] sm:$0xff]  ;;  %v567_v25 = vld [vmem:[%s1977_s4 + $0x58] sm:$0xff]  ;;  %v564_v26 = vld [vmem:[%s1977_s4 + $0x40] sm:$0xff] }
  0x28   : > { %v565_v27 = vld [vmem:[%s1977_s4 + $0x48] sm:$0xff]  ;;  %v562_v28 = vld [vmem:[%s1977_s4 + $0x30] sm:$0xff]  ;;  %v563_v29 = vld [vmem:[%s1977_s4 + $0x38] sm:$0xff] }
  0x29   : > { %1405 = vmatmul.mubr.msk.f32.gmra.mxu0 %vm382_vm1, %v329_v11  ;;  %v560_v30 = vld [vmem:[%s1977_s4 + $0x20] sm:$0xff]  ;;  %v561_v31 = vld [vmem:[%s1977_s4 + $0x28] sm:$0xff]  ;;  %v558_v32 = vld [vmem:[%s1977_s4 + $0x10] sm:$0xff] }
  0x2a   : > { %1407 = vmatprep.mubr.msk.f32.mxu0 %vm382_vm1, %v330_v12  ;;  %354 = vperm.xlu0 %1527, %v336_v13   ;;  %v559_v33 = vld [vmem:[%s1977_s4 + $0x18] sm:$0xff]  ;;  %v556_v34 = vld [vmem:[%s1977_s4] sm:$0xff]  ;;  %v557_v35 = vld [vmem:[%s1977_s4 + $0x8] sm:$0xff] }
  0x2b   : > { %359 = vperm.xlu1 %1528, %v337_v14   ;;  %v886_v36 = vld [vmem:[%s1979_s6] sm:$0xff]  ;;  %v887_v37 = vld [vmem:[%s1979_s6 + $0x8] sm:$0xff]  ;;  %v888_v38 = vld [vmem:[%s1979_s6 + $0x10] sm:$0xff] }
  0x2c   : > { %v889_v39 = vld [vmem:[%s1979_s6 + $0x18] sm:$0xff]  ;;  %v890_v40 = vld [vmem:[%s1979_s6 + $0x20] sm:$0xff]  ;;  %v891_v41 = vld [vmem:[%s1979_s6 + $0x28] sm:$0xff] }
  0x2d   : > { %1408 = vmatmul.mubr.msk.f32.gmra.mxu0 %vm382_vm1, %v331_v15  ;;  %v892_v42 = vld [vmem:[%s1979_s6 + $0x30] sm:$0xff]  ;;  %v893_v43 = vld [vmem:[%s1979_s6 + $0x38] sm:$0xff]  ;;  %v894_v44 = vld [vmem:[%s1979_s6 + $0x40] sm:$0xff] }
  0x2e   : > { %1410 = vmatprep.mubr.msk.f32.mxu0 %vm382_vm1, %v332_v16  ;;  %344 = vperm.xlu0 %1527, %v334_v17   ;;  %v895_v45 = vld [vmem:[%s1979_s6 + $0x48] sm:$0xff]  ;;  %v896_v46 = vld [vmem:[%s1979_s6 + $0x50] sm:$0xff]  ;;  %v897_v47 = vld [vmem:[%s1979_s6 + $0x58] sm:$0xff] }
  0x2f   : > { %349 = vperm.xlu1 %1528, %v335_v18   ;;  %v898_v48 = vld [vmem:[%s1979_s6 + $0x60] sm:$0xff]  ;;  %v899_v49 = vld [vmem:[%s1979_s6 + $0x68] sm:$0xff]  ;;  %v900_v50 = vld [vmem:[%s1979_s6 + $0x70] sm:$0xff] }
  0x30   : > { %v901_v51 = vld [vmem:[%s1979_s6 + $0x78] sm:$0xff]  ;;  %v1529_v52 = vld [vmem:[%s1976_s3] sm:$0xff]  }
  0x31   : > { %1411 = vmatmul.mubr.msk.f32.gmra.mxu0 %vm382_vm1, %v333_v19  ;;  %1421 = vmatprep.mubr.msk.bf16.mxu1 %vm692_vm2, %v1529_v52 }
  0x32   : > { %644 = vperm.xlu0 %1527, %v570_v20  }
  0x33   : > { %649 = vperm.xlu1 %1528, %v571_v21  }
  0x36   : > { %634 = vperm.xlu0 %1527, %v568_v22  }
  0x37   : > { %639 = vperm.xlu1 %1528, %v569_v23  }
  0x3a   : > { %624 = vperm.xlu0 %1527, %v566_v24  }
  0x3b   : > { %629 = vperm.xlu1 %1528, %v567_v25  }
  0x3e   : > { %614 = vperm.xlu0 %1527, %v564_v26  }
  0x3f   : > { %619 = vperm.xlu1 %1528, %v565_v27  }
  0x42   : > { %604 = vperm.xlu0 %1527, %v562_v28  }
  0x43   : > { %609 = vperm.xlu1 %1528, %v563_v29  }
  0x46   : > { %594 = vperm.xlu0 %1527, %v560_v30  }
  0x47   : > { %599 = vperm.xlu1 %1528, %v561_v31  }
  0x4a   : > { %584 = vperm.xlu0 %1527, %v558_v32  }
  0x4b   : > { %589 = vperm.xlu1 %1528, %v559_v33   ;;  %v1530_v33 = vld [vmem:[%s1976_s3 + $0x8] sm:$0xff]  }
  0x4e   : > { %574 = vperm.xlu0 %1527, %v556_v34   ;;  %v1531_v34 = vld [vmem:[%s1976_s3 + $0x10] sm:$0xff]  }
  0x4f   : > { %579 = vperm.xlu1 %1528, %v557_v35   ;;  %v1532_v35 = vld [vmem:[%s1976_s3 + $0x18] sm:$0xff]  }
  0x52   : > { %904 = vperm.xlu0 %1527, %v886_v36   ;;  %v1533_v36 = vld [vmem:[%s1976_s3 + $0x20] sm:$0xff]  }
  0x53   : > { %909 = vperm.xlu1 %1528, %v887_v37   ;;  %v1534_v37 = vld [vmem:[%s1976_s3 + $0x28] sm:$0xff]  }
  0x56   : > { %914 = vperm.xlu0 %1527, %v888_v38   ;;  %v1535_v38 = vld [vmem:[%s1976_s3 + $0x30] sm:$0xff]  }
  0x57   : > { %919 = vperm.xlu1 %1528, %v889_v39   ;;  %v1536_v39 = vld [vmem:[%s1976_s3 + $0x38] sm:$0xff]  }
  0x5a   : > { %924 = vperm.xlu0 %1527, %v890_v40   ;;  %v1537_v40 = vld [vmem:[%s1978_s5] sm:$0xff]  }
  0x5b   : > { %929 = vperm.xlu1 %1528, %v891_v41   ;;  %v1538_v41 = vld [vmem:[%s1978_s5 + $0x30] sm:$0xff]   ;;  %1453 = vmatprep.mubr.bf16.mxu0 %v1537_v40 }
  0x5e   : > { %934 = vperm.xlu0 %1527, %v892_v42  }
  0x5f   : > { %939 = vperm.xlu1 %1528, %v893_v43  }
  0x62   : > { %944 = vperm.xlu0 %1527, %v894_v44  }
  0x63   : > { %949 = vperm.xlu1 %1528, %v895_v45  }
  0x66   : > { %954 = vperm.xlu0 %1527, %v896_v46  }
  0x67   : > { %959 = vperm.xlu1 %1528, %v897_v47  }
  0x6a   : > { %964 = vperm.xlu0 %1527, %v898_v48  }
  0x6b   : > { %969 = vperm.xlu1 %1528, %v899_v49  }
  0x6e   : > { %974 = vperm.xlu0 %1527, %v900_v50  }
  0x6f   : > { %979 = vperm.xlu1 %1528, %v901_v51  }
  0x9d   : > { %v375_v53 = vpop.permute.xlu0 %374 }
  0x9e   : > { %v365_v55 = vpop.permute.xlu1 %364 }
  0xa1   : > { %v380_v58 = vpop.permute.xlu0 %379 }
  0xa2   : > { %v370_v60 = vpop.permute.xlu1 %369 }
  0xa5   : > { %v355_v63 = vpop.permute.xlu0 %354 }
  0xa6   : > { %v360_v4 = vpop.permute.xlu1 %359 }
  0xa9   : > { %v345_v10 = vpop.permute.xlu0 %344 }
  0xaa   : > { %v350_v19 = vpop.permute.xlu1 %349 }
  0xad   : > { %v645_v47 = vpop.permute.xlu0 %644 }
  0xae   : > { %v650_v45 = vpop.permute.xlu1 %649 }
  0xb1   : > { %v635_v52 = vpop.permute.xlu0 %634 }
  0xb2   : > { %v640_v50 = vpop.permute.xlu1 %639 }
  0xe5   : > { %v1403_v54 = vpop.f32.mrf.mxu0 }
  0xe6   : > { %v479_v21 = vadd.f32 %v1403_v54, %v350_v19 }
  0xe7   : > { %v473_v56 = vpop.f32.mrf.mxu0 }
  0xe8   : > { %v474_v14 = vadd.f32 %v473_v56, %v345_v10  ;;  %v521_v27 = vmul.f32 0.01, %v479_v21  ;;  %vm513_vm10 = vcmp.ge.f32.partialorder %v479_v21, 0.0 }
  0xe9   : > { %v1406_v57 = vpop.f32.mrf.mxu0 }
  0xea   : > { %v489_v11 = vadd.f32 %v1406_v57, %v360_v4  ;;  %v520_v25 = vmul.f32 0.01, %v474_v14  ;;  %vm512_vm9 = vcmp.ge.f32.partialorder %v474_v14, 0.0  ;;  %v529_v31 = vsel %vm513_vm10, %v479_v21, %v521_v27  ;;  %v625_v57 = vpop.permute.xlu0 %624 }
  0xeb   : > { %v483_v59 = vpop.f32.mrf.mxu0 }
  0xec   : > { %v484_v6 = vadd.f32 %v483_v59, %v355_v63  ;;  %v523_v22 = vmul.f32 0.01, %v489_v11  ;;  %vm515_vm8 = vcmp.ge.f32.partialorder %v489_v11, 0.0  ;;  %v528_v30 = vsel %vm512_vm9, %v474_v14, %v520_v25 }
  0xed   : > { %v1409_v61 = vpop.f32.mrf.mxu0  ;;  %v536_v32 = vpack.c.bf16 %v529_v31, %v528_v30 }
  0xee   : > { %v499_v2 = vadd.f32 %v1409_v61, %v370_v60  ;;  %v522_v15 = vmul.f32 0.01, %v484_v6  ;;  %vm514_vm7 = vcmp.ge.f32.partialorder %v484_v6, 0.0  ;;  %v531_v28 = vsel %vm515_vm8, %v489_v11, %v523_v22  ;;  %v615_v63 = vpop.permute.xlu0 %614 }
  0xef   : > { %v493_v62 = vpop.f32.mrf.mxu0 }
  0xf0   : > { %v494_v0 = vadd.f32 %v493_v62, %v365_v55  ;;  %v525_v12 = vmul.f32 0.01, %v499_v2  ;;  %vm517_vm6 = vcmp.ge.f32.partialorder %v499_v2, 0.0  ;;  %v530_v26 = vsel %vm514_vm7, %v484_v6, %v522_v15  ;;  %v630_v55 = vpop.permute.xlu1 %629 }
  0xf1   : > { %v1412_v1 = vpop.f32.mrf.mxu0  ;;  %v537_v29 = vpack.c.bf16 %v531_v28, %v530_v26 }
  0xf2   : > { %v509_v3 = vadd.f32 %v1412_v1, %v380_v58  ;;  %v524_v7 = vmul.f32 0.01, %v494_v0  ;;  %vm516_vm3 = vcmp.ge.f32.partialorder %v494_v0, 0.0  ;;  %v533_v23 = vsel %vm517_vm6, %v499_v2, %v525_v12  ;;  %v605_v12 = vpop.permute.xlu0 %604 }
  0xf3   : > { %v503_v5 = vpop.f32.mrf.mxu0 }
  0xf4   : > { %v527_v8 = vmul.f32 0.01, %v509_v3  ;;  %v504_v9 = vadd.f32 %v503_v5, %v375_v53  ;;  %vm519_vm4 = vcmp.ge.f32.partialorder %v509_v3, 0.0  ;;  %v532_v18 = vsel %vm516_vm3, %v494_v0, %v524_v7  ;;  %v620_v60 = vpop.permute.xlu1 %619 }
  0xf5   : > { %v538_v24 = vpack.c.bf16 %v533_v23, %v532_v18 }
  0xf6   : > { %v526_v13 = vmul.f32 0.01, %v504_v9  ;;  %vm518_vm5 = vcmp.ge.f32.partialorder %v504_v9, 0.0  ;;  %v535_v17 = vsel %vm519_vm4, %v509_v3, %v527_v8  ;;  %v595_v28 = vpop.permute.xlu0 %594 }
  0xf8   : > { %v534_v16 = vsel %vm518_vm5, %v504_v9, %v526_v13  ;;  %v610_v6 = vpop.permute.xlu1 %609 }
  0xf9   : > { %v539_v20 = vpack.c.bf16 %v535_v17, %v534_v16 }
  0xfa   : > { %v585_v40 = vpop.permute.xlu0 %584 }
  0xfb   : > { %1413 = vmatprep.subr.bf16.mxu1 %v539_v20 }
  0xfc   : > { %1414 = vmatpush3.bf16.msra.mxu1 %v539_v20  ;;  %v600_v23 = vpop.permute.xlu1 %599 }
  0xfd   : > { %1415 = vmatprep.subr.bf16.mxu1 %v538_v24 }
 0x100   : > { %1416 = vmatpush3.bf16.msra.mxu1 %v538_v24 }
 0x101   : > { %1417 = vmatprep.subr.bf16.mxu1 %v537_v29 }
 0x104   : > { %1418 = vmatpush3.bf16.msra.mxu1 %v537_v29 }
 0x105   : > { %1419 = vmatprep.subr.bf16.mxu1 %v536_v32 }
 0x108   : > { %1420 = vmatpush3.bf16.msra.mxu1 %v536_v32 }
 0x10b   : > { %1422 = vmatmul.mubr.msk.bf16.vlgmr.msra.gmra.mxu1 %vm692_vm2, %v1530_v33 }
 0x10c   : > { %1425 = vmatprep.mubr.msk.bf16.mxu1 %vm692_vm2, %v1531_v34 }
 0x113   : > { %1426 = vmatmul.mubr.msk.bf16.gmra.mxu1 %vm692_vm2, %v1532_v35 }
 0x114   : > { %1429 = vmatprep.mubr.msk.bf16.mxu1 %vm692_vm2, %v1533_v36  ;;  %v590_v36 = vpop.permute.xlu1 %589 }
 0x11b   : > { %1430 = vmatmul.mubr.msk.bf16.gmra.mxu1 %vm692_vm2, %v1534_v37 }
 0x11c   : > { %1433 = vmatprep.mubr.msk.bf16.mxu1 %vm692_vm2, %v1535_v38 }
 0x123   : > { %1434 = vmatmul.mubr.msk.bf16.gmra.mxu1 %vm692_vm2, %v1536_v39 }
 0x124   : > { %1465 = vmatprep.mubr.bf16.mxu1 %v1538_v41 }
 0x1cb   : > { %v1876_v42 = vpop.f32.mrf.mxu1 }
 0x1cd   : > { %v1878_v43 = vpop.f32.mrf.mxu1 }
 0x1cf   : > { %v1880_v44 = vpop.f32.mrf.mxu1 }
 0x1d1   : > { %v1882_v46 = vpop.f32.mrf.mxu1 }
 0x1d3   : > { %v1427_v48 = vpop.f32.mrf.mxu1 }
 0x1d4   : > { %v776_v29 = vadd.f32 %v1427_v48, %v605_v12 }
 0x1d5   : > { %v1884_v49 = vpop.f32.mrf.mxu1 }
 0x1d6   : > { %v836_v37 = vmul.f32 0.01, %v776_v29  ;;  %v768_v38 = vadd.f32 %v1884_v49, %v595_v28  ;;  %vm820_vm4 = vcmp.ge.f32.partialorder %v776_v29, 0.0 }
 0x1d7   : > { %v1428_v51 = vpop.f32.mrf.mxu1 }
 0x1d8   : > { %v779_v25 = vadd.f32 %v1428_v51, %v610_v6  ;;  %v852_v51 = vsel %vm820_vm4, %v776_v29, %v836_v37  ;;  %vm818_vm6 = vcmp.ge.f32.partialorder %v768_v38, 0.0  ;;  %v1543_v6 = vld [vmem:[%s1978_s5 + $0x20] sm:$0xff]  }
 0x1d9   : > { %v770_v53 = vpop.f32.mrf.mxu1 }
 0x1da   : > { %v837_v33 = vmul.f32 0.01, %v779_v25  ;;  %v771_v34 = vadd.f32 %v770_v53, %v600_v23  ;;  %vm821_vm3 = vcmp.ge.f32.partialorder %v779_v25, 0.0  ;;  %v580_v53 = vpop.permute.xlu1 %579 }
 0x1db   : > { %v1431_v54 = vpop.f32.mrf.mxu1 }
 0x1dc   : > { %v792_v7 = vadd.f32 %v1431_v54, %v625_v57  ;;  %v835_v48 = vmul.f32 0.01, %v771_v34  ;;  %vm819_vm5 = vcmp.ge.f32.partialorder %v771_v34, 0.0 }
 0x1dd   : > { %v783_v56 = vpop.f32.mrf.mxu1 }
 0x1de   : > { %v840_v19 = vmul.f32 0.01, %v792_v7  ;;  %v784_v20 = vadd.f32 %v783_v56, %v615_v63  ;;  %vm824_vm0 = vcmp.ge.f32.partialorder %v792_v7, 0.0  ;;  %v851_v56 = vsel %vm819_vm5, %v771_v34, %v835_v48 }
 0x1df   : > { %v1432_v58 = vpop.f32.mrf.mxu1 }
 0x1e0   : > { %v795_v2 = vadd.f32 %v1432_v58, %v630_v55  ;;  %v856_v30 = vsel %vm824_vm0, %v792_v7, %v840_v19  ;;  %v838_v31 = vmul.f32 0.01, %v784_v20  ;;  %vm822_vm2 = vcmp.ge.f32.partialorder %v784_v20, 0.0  ;;  %v1544_v7 = vld [vmem:[%s1978_s5 + $0x28] sm:$0xff]  }
 0x1e1   : > { %v786_v59 = vpop.f32.mrf.mxu1  ;;  %v755_v55 = vadd.f32 %v1882_v46, %v580_v53 }
 0x1e2   : > { %v841_v13 = vmul.f32 0.01, %v795_v2  ;;  %v787_v14 = vadd.f32 %v786_v59, %v620_v60  ;;  %vm825_vm15 = vcmp.ge.f32.partialorder %v795_v2, 0.0  ;;  %v854_v39 = vsel %vm822_vm2, %v784_v20, %v838_v31 }
 0x1e3   : > { %v1435_v61 = vpop.f32.mrf.mxu1  ;;  %vm815_vm9 = vcmp.ge.f32.partialorder %v755_v55, 0.0 }
 0x1e4   : > { %v808_v62 = vadd.f32 %v1435_v61, %v645_v47  ;;  %v857_v26 = vsel %vm825_vm15, %v795_v2, %v841_v13  ;;  %v839_v27 = vmul.f32 0.01, %v787_v14  ;;  %vm823_vm1 = vcmp.ge.f32.partialorder %v787_v14, 0.0  ;;  %v1539_v2 = vld [vmem:[%s1978_s5 + $0x8] sm:$0xff]  }
 0x1e5   : > { %v799_v0 = vpop.f32.mrf.mxu1  ;;  %v867_v32 = vpack.c.bf16 %v857_v26, %v856_v30  ;;  %v853_v47 = vsel %vm821_vm3, %v779_v25, %v837_v33  ;;  %v831_v61 = vmul.f32 0.01, %v755_v55 }
 0x1e6   : > { %v800_v1 = vadd.f32 %v799_v0, %v635_v52  ;;  %v844_v4 = vmul.f32 0.01, %v808_v62  ;;  %vm828_vm11 = vcmp.ge.f32.partialorder %v808_v62, 0.0  ;;  %v855_v35 = vsel %vm823_vm1, %v787_v14, %v839_v27 }
 0x1e7   : > { %v1436_v3 = vpop.f32.mrf.mxu1  ;;  %v866_v41 = vpack.c.bf16 %v855_v35, %v854_v39  ;;  %v834_v52 = vmul.f32 0.01, %v768_v38  ;;  %v865_v49 = vpack.c.bf16 %v853_v47, %v852_v51  ;;  %v847_v0 = vsel %vm815_vm9, %v755_v55, %v831_v61 }
 0x1e8   : > { %v811_v5 = vadd.f32 %v1436_v3, %v650_v45  ;;  %v842_v9 = vmul.f32 0.01, %v800_v1  ;;  %vm826_vm13 = vcmp.ge.f32.partialorder %v800_v1, 0.0  ;;  %v860_v15 = vsel %vm828_vm11, %v808_v62, %v844_v4  ;;  %v1540_v3 = vld [vmem:[%s1978_s5 + $0x38] sm:$0xff]   ;;  %v1541_v4 = vld [vmem:[%s1978_s5 + $0x10] sm:$0xff]  }
 0x1e9   : > { %v802_v8 = vpop.f32.mrf.mxu1  ;;  %v763_v45 = vadd.f32 %v1880_v44, %v590_v36  ;;  %v575_v44 = vpop.permute.xlu0 %574  ;;  %v850_v59 = vsel %vm818_vm6, %v768_v38, %v834_v52  ;;  %vm1191_vm11 = vcmask 7168  }
 0x1ea   : > { %vm829_vm12 = vcmp.ge.f32.partialorder %v811_v5, 0.0  ;;  %v845_v10 = vmul.f32 0.01, %v811_v5  ;;  %v803_v11 = vadd.f32 %v802_v8, %v640_v50  ;;  %v858_v21 = vsel %vm826_vm13, %v800_v1, %v842_v9 }
 0x1eb   : > { %v760_v50 = vadd.f32 %v1876_v42, %v585_v40  ;;  %v833_v54 = vmul.f32 0.01, %v763_v45  ;;  %vm817_vm7 = vcmp.ge.f32.partialorder %v763_v45, 0.0  ;;  %v752_v58 = vadd.f32 %v1878_v43, %v575_v44 }
 0x1ec   : > { %v861_v16 = vsel %vm829_vm12, %v811_v5, %v845_v10  ;;  %vm827_vm14 = vcmp.ge.f32.partialorder %v803_v11, 0.0  ;;  %v843_v17 = vmul.f32 0.01, %v803_v11  ;;  %v864_v42 = vpack.c.bf16 %v851_v56, %v850_v59  ;;  %v1542_v5 = vld [vmem:[%s1978_s5 + $0x18] sm:$0xff]   ;;  %v910_v10 = vpop.permute.xlu1 %909  ;;  %v1129_v59 = vld [vmem:[#allocation2 + $0x10] sm:$0xff] }
 0x1ed   : > { %v869_v18 = vpack.c.bf16 %v861_v16, %v860_v15  ;;  %v832_v57 = vmul.f32 0.01, %v760_v50  ;;  %vm816_vm8 = vcmp.ge.f32.partialorder %v760_v50, 0.0  ;;  %v849_v60 = vsel %vm817_vm7, %v763_v45, %v833_v54  ;;  %v905_v8 = vpop.permute.xlu0 %904 }
 0x1ee   : > { %v859_v22 = vsel %vm827_vm14, %v803_v11, %v843_v17  ;;  %v830_v62 = vmul.f32 0.01, %v752_v58  ;;  %vm814_vm10 = vcmp.ge.f32.partialorder %v752_v58, 0.0 }
 0x1ef   : > { %v868_v24 = vpack.c.bf16 %v859_v22, %v858_v21  ;;  %1437 = vmatprep.subr.bf16.mxu0 %v869_v18  ;;  %1469 = vmatprep.subr.bf16.mxu1 %v869_v18  ;;  %v848_v46 = vsel %vm816_vm8, %v760_v50, %v832_v57 }
 0x1f0   : > { %1438 = vmatpush3.bf16.msra.mxu0 %v869_v18  ;;  %1477 = vmatpush3.bf16.msra.mxu1 %v869_v18  ;;  %v863_v63 = vpack.c.bf16 %v849_v60, %v848_v46  ;;  %v846_v43 = vsel %vm814_vm10, %v752_v58, %v830_v62  ;;  %v920_v12 = vpop.permute.xlu1 %919  ;;  %v1139_v60 = vld [vmem:[#allocation2 + $0x60] sm:$0xff] }
 0x1f1   : > { %1439 = vmatprep.subr.bf16.mxu0 %v868_v24  ;;  %1470 = vmatprep.subr.bf16.mxu1 %v868_v24  ;;  %v862_v1 = vpack.c.bf16 %v847_v0, %v846_v43  ;;  %v915_v9 = vpop.permute.xlu0 %914  ;;  %v1127_v62 = vld [vmem:[#allocation2] sm:$0xff]  ;;  %v1128_v43 = vld [vmem:[#allocation2 + $0x8] sm:$0xff] }
 0x1f4   : > { %1440 = vmatpush3.bf16.msra.mxu0 %v868_v24  ;;  %1478 = vmatpush3.bf16.msra.mxu1 %v868_v24  ;;  %v930_v14 = vpop.permute.xlu1 %929 }
 0x1f5   : > { %1441 = vmatprep.subr.bf16.mxu0 %v867_v32  ;;  %1471 = vmatprep.subr.bf16.mxu1 %v867_v32  ;;  %v925_v11 = vpop.permute.xlu0 %924 }
 0x1f8   : > { %1442 = vmatpush3.bf16.msra.mxu0 %v867_v32  ;;  %1479 = vmatpush3.bf16.msra.mxu1 %v867_v32  ;;  %v940_v16 = vpop.permute.xlu1 %939 }
 0x1f9   : > { %1443 = vmatprep.subr.bf16.mxu0 %v866_v41  ;;  %1472 = vmatprep.subr.bf16.mxu1 %v866_v41  ;;  %v935_v13 = vpop.permute.xlu0 %934 }
 0x1fc   : > { %1444 = vmatpush3.bf16.msra.mxu0 %v866_v41  ;;  %1480 = vmatpush3.bf16.msra.mxu1 %v866_v41  ;;  %v950_v18 = vpop.permute.xlu1 %949 }
 0x1fd   : > { %1445 = vmatprep.subr.bf16.mxu0 %v865_v49  ;;  %1473 = vmatprep.subr.bf16.mxu1 %v865_v49  ;;  %v945_v15 = vpop.permute.xlu0 %944 }
 0x200   : > { %1446 = vmatpush3.bf16.msra.mxu0 %v865_v49  ;;  %1481 = vmatpush3.bf16.msra.mxu1 %v865_v49  ;;  %v960_v27 = vpop.permute.xlu1 %959 }
 0x201   : > { %1447 = vmatprep.subr.bf16.mxu0 %v864_v42  ;;  %1474 = vmatprep.subr.bf16.mxu1 %v864_v42  ;;  %v955_v17 = vpop.permute.xlu0 %954 }
 0x204   : > { %1448 = vmatpush3.bf16.msra.mxu0 %v864_v42  ;;  %1482 = vmatpush3.bf16.msra.mxu1 %v864_v42  ;;  %v970_v37 = vpop.permute.xlu1 %969 }
 0x205   : > { %1449 = vmatprep.subr.bf16.mxu0 %v863_v63  ;;  %1475 = vmatprep.subr.bf16.mxu1 %v863_v63  ;;  %v965_v21 = vpop.permute.xlu0 %964 }
 0x208   : > { %1450 = vmatpush3.bf16.msra.mxu0 %v863_v63  ;;  %1483 = vmatpush3.bf16.msra.mxu1 %v863_v63  ;;  %v980_v57 = vpop.permute.xlu1 %979 }
 0x209   : > { %1451 = vmatprep.subr.bf16.mxu0 %v862_v1  ;;  %1476 = vmatprep.subr.bf16.mxu1 %v862_v1  ;;  %v975_v54 = vpop.permute.xlu0 %974 }
 0x20c   : > { %1452 = vmatpush3.bf16.msra.mxu0 %v862_v1  ;;  %1484 = vmatpush3.bf16.msra.mxu1 %v862_v1 }
 0x20f   : > { %1454 = vmatmul.mubr.bf16.vlgmr.msra.gmra.mxu0 %v1539_v2  ;;  %1466 = vmatmul.mubr.bf16.vlgmr.msra.gmra.mxu1 %v1540_v3  ;;  %v1130_v3 = vld [vmem:[#allocation2 + $0x18] sm:$0xff] }
 0x210   : > { %1457 = vmatprep.mubr.bf16.mxu0 %v1541_v4 }
 0x217   : > { %1458 = vmatmul.mubr.bf16.gmra.mxu0 %v1542_v5 }
 0x218   : > { %1461 = vmatprep.mubr.bf16.mxu0 %v1543_v6  ;;  %v1133_v6 = vld [vmem:[#allocation2 + $0x30] sm:$0xff] }
 0x21f   : > { %1462 = vmatmul.mubr.bf16.gmra.mxu0 %v1544_v7 }
 0x2cf   : > { %v1455_v19 = vpop.f32.mrf.mxu0  ;;  %v1467_v20 = vpop.f32.mrf.mxu1 }
 0x2d0   : > { %v1073_v22 = vadd.f32 %v1455_v19, %v915_v9  ;;  %v1121_v56 = vadd.f32 %v1467_v20, %v975_v54  ;;  %v1140_v9 = vld [vmem:[#allocation2 + $0x68] sm:$0xff] }
 0x2d1   : > { %v1064_v23 = vpop.f32.mrf.mxu0  ;;  %v1112_v24 = vpop.f32.mrf.mxu1 }
 0x2d2   : > { %v1113_v25 = vadd.f32 %v1112_v24, %v965_v21  ;;  %1147 = vmax.xlane.f32.xlu0 %v1073_v22  ;;  %v1065_v28 = vadd.f32 %v1064_v23, %v905_v8  ;;  %v1132_v21 = vld [vmem:[#allocation2 + $0x28] sm:$0xff]  ;;  %v1135_v24 = vld [vmem:[#allocation2 + $0x40] sm:$0xff] }
 0x2d3   : > { %v1456_v26 = vpop.f32.mrf.mxu0  ;;  %v1468_v29 = vpop.f32.mrf.mxu1 }
 0x2d4   : > { %1167 = vmax.xlane.f32.xlu1 %v1113_v25  ;;  %v1076_v33 = vadd.f32 %v1456_v26, %v920_v12  ;;  %v1124_v58 = vadd.f32 %v1468_v29, %v980_v57  ;;  %v1131_v12 = vld [vmem:[#allocation2 + $0x20] sm:$0xff] }
 0x2d5   : > { %v1067_v30 = vpop.f32.mrf.mxu0  ;;  %v1115_v34 = vpop.f32.mrf.mxu1 }
 0x2d6   : > { %v1068_v31 = vadd.f32 %v1067_v30, %v910_v10  ;;  %1143 = vmax.xlane.f32.xlu0 %v1065_v28  ;;  %v1116_v39 = vadd.f32 %v1115_v34, %v970_v37  ;;  %v1141_v30 = vld [vmem:[#allocation2 + $0x70] sm:$0xff]  ;;  %v1142_v37 = vld [vmem:[#allocation2 + $0x78] sm:$0xff] }
 0x2d7   : > { %v1459_v32 = vpop.f32.mrf.mxu0 }
 0x2d8   : > { %1145 = vmax.xlane.f32.xlu1 %v1068_v31  ;;  %v1089_v36 = vadd.f32 %v1459_v32, %v935_v13 }
 0x2d9   : > { %v1080_v35 = vpop.f32.mrf.mxu0 }
 0x2da   : > { %1149 = vmax.xlane.f32.xlu0 %v1076_v33  ;;  %v1081_v41 = vadd.f32 %v1080_v35, %v925_v11  ;;  %v1136_v33 = vld [vmem:[#allocation2 + $0x48] sm:$0xff] }
 0x2db   : > { %v1460_v38 = vpop.f32.mrf.mxu0 }
 0x2dc   : > { %1155 = vmax.xlane.f32.xlu1 %v1089_v36  ;;  %v1092_v47 = vadd.f32 %v1460_v38, %v940_v16 }
 0x2dd   : > { %v1083_v40 = vpop.f32.mrf.mxu0 }
 0x2de   : > { %1169 = vmax.xlane.f32.xlu0 %v1116_v39  ;;  %v1084_v51 = vadd.f32 %v1083_v40, %v930_v14 }
 0x2df   : > { %v1463_v45 = vpop.f32.mrf.mxu0 }
 0x2e0   : > { %1151 = vmax.xlane.f32.xlu1 %v1081_v41  ;;  %v1105_v50 = vadd.f32 %v1463_v45, %v955_v17 }
 0x2e1   : > { %v1096_v48 = vpop.f32.mrf.mxu0 }
 0x2e2   : > { %1157 = vmax.xlane.f32.xlu0 %v1092_v47  ;;  %v1097_v53 = vadd.f32 %v1096_v48, %v945_v15  ;;  %v1134_v15 = vld [vmem:[#allocation2 + $0x38] sm:$0xff] }
 0x2e3   : > { %v1464_v52 = vpop.f32.mrf.mxu0 }
 0x2e4   : > { %1163 = vmax.xlane.f32.xlu1 %v1105_v50  ;;  %v1108_v49 = vadd.f32 %v1464_v52, %v960_v27  ;;  %v1138_v27 = vld [vmem:[#allocation2 + $0x58] sm:$0xff] }
 0x2e5   : > { %v1099_v55 = vpop.f32.mrf.mxu0 }
 0x2e6   : > { %1153 = vmax.xlane.f32.xlu0 %v1084_v51  ;;  %v1100_v44 = vadd.f32 %v1099_v55, %v950_v18  ;;  %v1137_v18 = vld [vmem:[#allocation2 + $0x50] sm:$0xff] }
 0x2e8   : > { %1159 = vmax.xlane.f32.xlu1 %v1097_v53 }
 0x2ea   : > { %1165 = vmax.xlane.f32.xlu0 %v1108_v49 }
 0x2ec   : > { %1171 = vmax.xlane.f32.xlu1 %v1121_v56 }
 0x2ee   : > { %1161 = vmax.xlane.f32.xlu0 %v1100_v44 }
 0x2f2   : > { %1173 = vmax.xlane.f32.xlu0 %v1124_v58 }
 0x35b   : > { %v1148_v42 = vpop.xlane.xlu0 %1147 }
 0x35c   : > { %v1177_v61 = vmax.f32 %v1129_v59, %v1148_v42 }
 0x35d   : > { %v1168_v46 = vpop.xlane.xlu1 %1167 }
 0x35e   : > { %1194 = vst.msk [vmem:[#allocation2 + $0x10] sm:$0xff] %vm1191_vm11, %v1177_v61  ;;  %v1187_v63 = vmax.f32 %v1139_v60, %v1168_v46 }
 0x35f   : > { %v1144_v0 = vpop.xlane.xlu0 %1143 }
 0x360   : > { %1204 = vst.msk [vmem:[#allocation2 + $0x60] sm:$0xff] %vm1191_vm11, %v1187_v63  ;;  %v1175_v1 = vmax.f32 %v1127_v62, %v1144_v0 }
 0x361   : > { %v1146_v2 = vpop.xlane.xlu1 %1145 }
 0x362   : > { %1192 = vst.msk [vmem:[#allocation2] sm:$0xff] %vm1191_vm11, %v1175_v1  ;;  %v1176_v4 = vmax.f32 %v1128_v43, %v1146_v2 }
 0x363   : > { %v1150_v5 = vpop.xlane.xlu0 %1149 }
 0x364   : > { %1193 = vst.msk [vmem:[#allocation2 + $0x8] sm:$0xff] %vm1191_vm11, %v1176_v4  ;;  %v1178_v7 = vmax.f32 %v1130_v3, %v1150_v5 }
 0x365   : > { %v1156_v8 = vpop.xlane.xlu1 %1155 }
 0x366   : > { %1195 = vst.msk [vmem:[#allocation2 + $0x18] sm:$0xff] %vm1191_vm11, %v1178_v7  ;;  %v1181_v10 = vmax.f32 %v1133_v6, %v1156_v8 }
 0x367   : > { %v1170_v11 = vpop.xlane.xlu0 %1169 }
 0x368   : > { %1198 = vst.msk [vmem:[#allocation2 + $0x30] sm:$0xff] %vm1191_vm11, %v1181_v10  ;;  %v1188_v13 = vmax.f32 %v1140_v9, %v1170_v11 }
 0x369   : > { %v1152_v14 = vpop.xlane.xlu1 %1151 }
 0x36a   : > { %1205 = vst.msk [vmem:[#allocation2 + $0x68] sm:$0xff] %vm1191_vm11, %v1188_v13  ;;  %v1179_v16 = vmax.f32 %v1131_v12, %v1152_v14 }
 0x36b   : > { %v1158_v17 = vpop.xlane.xlu0 %1157 }
 0x36c   : > { %1196 = vst.msk [vmem:[#allocation2 + $0x20] sm:$0xff] %vm1191_vm11, %v1179_v16  ;;  %v1182_v19 = vmax.f32 %v1134_v15, %v1158_v17 }
 0x36d   : > { %v1164_v20 = vpop.xlane.xlu1 %1163 }
 0x36e   : > { %1199 = vst.msk [vmem:[#allocation2 + $0x38] sm:$0xff] %vm1191_vm11, %v1182_v19  ;;  %v1185_v22 = vmax.f32 %v1137_v18, %v1164_v20 }
 0x36f   : > { %v1154_v23 = vpop.xlane.xlu0 %1153 }
 0x370   : > { %1202 = vst.msk [vmem:[#allocation2 + $0x50] sm:$0xff] %vm1191_vm11, %v1185_v22  ;;  %v1180_v25 = vmax.f32 %v1132_v21, %v1154_v23 }
 0x371   : > { %v1160_v26 = vpop.xlane.xlu1 %1159 }
 0x372   : > { %1197 = vst.msk [vmem:[#allocation2 + $0x28] sm:$0xff] %vm1191_vm11, %v1180_v25  ;;  %v1183_v28 = vmax.f32 %v1135_v24, %v1160_v26 }
 0x373   : > { %v1166_v29 = vpop.xlane.xlu0 %1165 }
 0x374   : > { %1200 = vst.msk [vmem:[#allocation2 + $0x40] sm:$0xff] %vm1191_vm11, %v1183_v28  ;;  %v1186_v31 = vmax.f32 %v1138_v27, %v1166_v29 }
 0x375   : > { %v1172_v32 = vpop.xlane.xlu1 %1171 }
 0x376   : > { %1203 = vst.msk [vmem:[#allocation2 + $0x58] sm:$0xff] %vm1191_vm11, %v1186_v31  ;;  %v1189_v34 = vmax.f32 %v1141_v30, %v1172_v32 }
 0x377   : > { %v1162_v35 = vpop.xlane.xlu0 %1161 }
 0x378   : > { %1206 = vst.msk [vmem:[#allocation2 + $0x70] sm:$0xff] %vm1191_vm11, %v1189_v34  ;;  %v1184_v36 = vmax.f32 %v1136_v33, %v1162_v35 }
 0x37a   : > { %1201 = vst.msk [vmem:[#allocation2 + $0x48] sm:$0xff] %vm1191_vm11, %v1184_v36  ;;  %1211 = sbr.rel (%p1358_p8) target bundleno = 904 (0x388), region = 56 }
 0x37b   : > { %v1174_v38 = vpop.xlane.xlu0 %1173 }
 0x37c   : > { %v1190_v39 = vmax.f32 %v1142_v37, %v1174_v38 }
 0x37e   : > { %1207 = vst.msk [vmem:[#allocation2 + $0x78] sm:$0xff] %vm1191_vm11, %v1190_v39 }
 0x37f   : > { %v1212_v40 = vld [vmem:[#allocation2] sm:$0xff]  ;;  %v1213_v41 = vld [vmem:[#allocation2 + $0x8] sm:$0xff]  ;;  %v1214_v45 = vld [vmem:[#allocation2 + $0x10] sm:$0xff] }
 0x380   : > { %1228 = vst.msk [vmem:[%s1664_s14] sm:$0xff] %vm1191_vm11, %v1212_v40  ;;  %1229 = vst.msk [vmem:[%s1664_s14 + $0x8] sm:$0xff] %vm1191_vm11, %v1213_v41  ;;  %v1215_v47 = vld [vmem:[#allocation2 + $0x18] sm:$0xff]  ;;  %v1216_v48 = vld [vmem:[#allocation2 + $0x20] sm:$0xff] }
 0x381   : > { %1230 = vst.msk [vmem:[%s1664_s14 + $0x10] sm:$0xff] %vm1191_vm11, %v1214_v45  ;;  %v1217_v50 = vld [vmem:[#allocation2 + $0x28] sm:$0xff]  ;;  %1231 = vst.msk [vmem:[%s1664_s14 + $0x18] sm:$0xff] %vm1191_vm11, %v1215_v47  ;;  %v1218_v51 = vld [vmem:[#allocation2 + $0x30] sm:$0xff] }
 0x382   : > { %1232 = vst.msk [vmem:[%s1664_s14 + $0x20] sm:$0xff] %vm1191_vm11, %v1216_v48  ;;  %1233 = vst.msk [vmem:[%s1664_s14 + $0x28] sm:$0xff] %vm1191_vm11, %v1217_v50  ;;  %v1219_v52 = vld [vmem:[#allocation2 + $0x38] sm:$0xff]  ;;  %v1220_v53 = vld [vmem:[#allocation2 + $0x40] sm:$0xff] }
 0x383   : > { %1234 = vst.msk [vmem:[%s1664_s14 + $0x30] sm:$0xff] %vm1191_vm11, %v1218_v51  ;;  %1235 = vst.msk [vmem:[%s1664_s14 + $0x38] sm:$0xff] %vm1191_vm11, %v1219_v52  ;;  %v1221_v49 = vld [vmem:[#allocation2 + $0x48] sm:$0xff]  ;;  %v1222_v54 = vld [vmem:[#allocation2 + $0x50] sm:$0xff] }
 0x384   : > { %1236 = vst.msk [vmem:[%s1664_s14 + $0x40] sm:$0xff] %vm1191_vm11, %v1220_v53  ;;  %v1223_v55 = vld [vmem:[#allocation2 + $0x58] sm:$0xff]  ;;  %1237 = vst.msk [vmem:[%s1664_s14 + $0x48] sm:$0xff] %vm1191_vm11, %v1221_v49  ;;  %v1224_v56 = vld [vmem:[#allocation2 + $0x60] sm:$0xff] }
 0x385   : > { %1238 = vst.msk [vmem:[%s1664_s14 + $0x50] sm:$0xff] %vm1191_vm11, %v1222_v54  ;;  %1239 = vst.msk [vmem:[%s1664_s14 + $0x58] sm:$0xff] %vm1191_vm11, %v1223_v55  ;;  %v1225_v44 = vld [vmem:[#allocation2 + $0x68] sm:$0xff]  ;;  %v1226_v57 = vld [vmem:[#allocation2 + $0x70] sm:$0xff] }
 0x386   : > { %1240 = vst.msk [vmem:[%s1664_s14 + $0x60] sm:$0xff] %vm1191_vm11, %v1224_v56  ;;  %1241 = vst.msk [vmem:[%s1664_s14 + $0x68] sm:$0xff] %vm1191_vm11, %v1225_v44  ;;  %v1227_v58 = vld [vmem:[#allocation2 + $0x78] sm:$0xff] }
 0x387   : > { %1242 = vst.msk [vmem:[%s1664_s14 + $0x70] sm:$0xff] %vm1191_vm11, %v1226_v57  ;;  %1243 = vst.msk [vmem:[%s1664_s14 + $0x78] sm:$0xff] %vm1191_vm11, %v1227_v58 }
 0x388 PF: > { %s17_s28 = sadd.s32 1, %s1583_s28   ;;  %s1981_s24 = smov %s1575_s26 }
 0x389   : > { %p14_p9 = scmp.ge.s32.totalorder %s17_s28, 6   ;;  %s1982_s25 = smov %s1579_s27 }
 0x38a   : > { %s1983_s26 = smov %s1986_s29  ;;  %s1984_s27 = smov %s1990_s30 }
 0x38b   :  { %16 = sbr.rel (!%p14_p9) target bundleno = 3 (0x3), region = 86 }

</bundles_post_ra>
